<compile_context>
chip_gen: v7x
topology: tpu7x:2x2x1
jax: 0.10.0
libtpu: 0.0.40
codegen_flags: <defaults>
</compile_context>

<pallas_src>
import functools

import jax
import jax.numpy as jnp
from jax.experimental import pallas as pl
from jax.experimental.pallas import tpu as pltpu

N_LAYERS = 5
KSIZE = 3


def _elu(x):
    # ELU(alpha=1): x if x > 0 else exp(x) - 1 (overflow branch discarded by where)
    return jnp.where(x > 0, x, jnp.exp(x) - 1.0)


def normalized_cnn_kernel(x_ref, w_ref, b_ref, o_ref, *, seq_len):
    x = x_ref[...]                                  # (C_pad, N) f32, N = TB*L (+pad)
    c_pad, n = x.shape
    c_out = o_ref.shape[0]

    # per-sequence lane position (batch is folded into the lane axis); (1, N)
    # masks are sublane-broadcast for free inside the wheres.
    pos = jax.lax.broadcasted_iota(jnp.int32, (1, n), 1) % seq_len
    is_first = pos == 0
    is_last = pos == seq_len - 1

    for i in range(N_LAYERS):
        # lane rotations (XLU) + reflect fix-up at sequence boundaries
        shift_m1 = pltpu.roll(x, shift=1, axis=1)       # value at lane-1
        shift_p1 = pltpu.roll(x, shift=n - 1, axis=1)   # value at lane+1
        left = jnp.where(is_first, shift_p1, shift_m1)  # reflect: pos0 <- pos1
        right = jnp.where(is_last, shift_m1, shift_p1)  # reflect: posL-1 <- posL-2

        # three accumulating tap-dots (no im2col concat slab)
        y = (jnp.dot(w_ref[i * KSIZE + 0], left, preferred_element_type=jnp.float32)
             + jnp.dot(w_ref[i * KSIZE + 1], x, preferred_element_type=jnp.float32)
             + jnp.dot(w_ref[i * KSIZE + 2], right, preferred_element_type=jnp.float32)
             + b_ref[i])
        x = y if i == N_LAYERS - 1 else _elu(y)

    o_ref[...] = x[:c_out]


def _pick_batch_tile(b, l, c_pad):
    """Largest lane-dense batch tile that fits the per-step VMEM budget.

    Returns (tb, n_pad): tb divides b with (tb*l) % 128 == 0, or (b, pad)
    padding the folded lane axis up to a multiple of 128 when no divisor of
    b yields a lane-dense tile.
    """
    # ~10 live (c_pad, N) f32 slabs per grid step: 2x double-buffered input
    # block, 2x output block, ~6 in-kernel temporaries (x, rolls, left/right, y).
    per_lane_bytes = 10 * c_pad * 4
    budget_bytes = 40 * 1024 * 1024          # conservative vs v7x's 64 MiB VMEM
    max_lanes = max(128, budget_bytes // per_lane_bytes)

    cands = [tb for tb in range(1, b + 1) if b % tb == 0 and (tb * l) % 128 == 0]
    if cands:
        fitting = [tb for tb in cands if tb * l <= max_lanes]
        if fitting:
            tb = max(fitting)
            if tb == b:
                # prefer >=2 grid steps (v7x has 2 TensorCores) if a smaller
                # still-large lane-dense tile exists
                smaller = [t for t in fitting if t < b and t * l >= 2048]
                if smaller:
                    tb = max(smaller)
            return tb, 0
        return min(cands), 0                 # smallest lane-dense tile
    # no lane-dense batch split: one slab, pad lanes to a multiple of 128
    return b, (-(b * l)) % 128


def normalized_cnn(x, mean_in, std_in, mean_out, std_out, weights, biases):
    """x: (B, C_in, L); weights[i]: (C_out, C_in_i, K); biases[i]: (C_out,)."""
    B, C_in, L = x.shape
    assert L >= 2, "reflect padding requires L >= 2"
    C_out = weights[0].shape[0]
    C_pad = ((max(C_in, C_out) + 7) // 8) * 8

    TB, n_pad = _pick_batch_tile(B, L, C_pad)
    N = B * L
    N_total = N + n_pad
    grid_n = 1 if n_pad else B // TB
    block_n = N_total // grid_n

    # ---- fold input/output normalization into the first/last conv layers ----
    w_list = [jnp.asarray(w, jnp.float32) for w in weights]
    b_list = [jnp.asarray(b, jnp.float32) for b in biases]

    s_in = 1.0 / jnp.asarray(std_in, jnp.float32).reshape(-1)        # (C_in,)
    m_in = jnp.asarray(mean_in, jnp.float32).reshape(-1) * s_in      # mean/std
    s_out = jnp.asarray(std_out, jnp.float32).reshape(-1)            # (C_out,)
    m_out = jnp.asarray(mean_out, jnp.float32).reshape(-1)

    b_list[0] = b_list[0] - jnp.einsum('ock,c->o', w_list[0], m_in)
    w_list[0] = w_list[0] * s_in[None, :, None]
    w_list[-1] = w_list[-1] * s_out[:, None, None]
    b_list[-1] = b_list[-1] * s_out + m_out

    # ---- fold batch into the lane axis: (B, C_in, L) -> (C_pad, N_total) ----
    xf = jnp.transpose(x, (1, 0, 2)).reshape(C_in, N)
    xf = jnp.pad(xf, ((0, C_pad - C_in), (0, n_pad)))

    # ---- pack per-tap conv weights to (N_LAYERS*K, C_pad, C_pad), biases to
    # (N_LAYERS, C_pad, 1); zero padding keeps padded channels zero end-to-end.
    w_slabs, b_slabs = [], []
    for w, b in zip(w_list, b_list):
        co, ci, _ = w.shape
        wp = jnp.zeros((KSIZE, C_pad, C_pad), jnp.float32)
        wp = wp.at[:, :co, :ci].set(jnp.transpose(w, (2, 0, 1)))
        w_slabs.append(wp)
        b_slabs.append(jnp.pad(b.reshape(co, 1), ((0, C_pad - co), (0, 0))))
    w_packed = jnp.concatenate(w_slabs, axis=0)     # (N_LAYERS*K, C_pad, C_pad)
    b_packed = jnp.stack(b_slabs)                   # (N_LAYERS, C_pad, 1)

    kernel = functools.partial(normalized_cnn_kernel, seq_len=L)

    out = pl.pallas_call(
        kernel,
        out_shape=jax.ShapeDtypeStruct((C_out, N_total), jnp.float32),
        grid_spec=pltpu.PrefetchScalarGridSpec(
            num_scalar_prefetch=0,
            grid=(grid_n,),
            in_specs=[
                pl.BlockSpec((C_pad, block_n), lambda i: (0, i)),
                pl.BlockSpec((N_LAYERS * KSIZE, C_pad, C_pad),
                             lambda i: (0, 0, 0)),
                pl.BlockSpec((N_LAYERS, C_pad, 1), lambda i: (0, 0, 0)),
            ],
            out_specs=pl.BlockSpec((C_out, block_n), lambda i: (0, i)),
        ),
        compiler_params=pltpu.CompilerParams(
            dimension_semantics=("parallel",),
            vmem_limit_bytes=48 * 1024 * 1024),
    )(xf, w_packed, b_packed)

    # drop lane padding, unfold lanes back to (B, C_out, L)
    out = out[:, :N]
    return jnp.transpose(out.reshape(C_out, B, L), (1, 0, 2))


def ref_forward(x, mean_in, std_in, mean_out, std_out, weights, biases):
    # pure-JAX reference of the eval-mode PyTorch forward
    x = (x - mean_in) / std_in
    for i, (w, b) in enumerate(zip(weights, biases)):
        L = x.shape[2]
        xp = jnp.pad(x, ((0, 0), (0, 0), (1, 1)), mode='reflect')
        y = b[None, :, None]
        for t in range(KSIZE):
            y = y + jnp.einsum('oc,bcl->bol', w[:, :, t], xp[:, :, t:t + L])
        x = y if i == len(weights) - 1 else jnp.where(y > 0, y, jnp.exp(y) - 1.0)
    return x * std_out + mean_out


if __name__ == "__main__":
    B, C_in, C_out, L = 2, 4, 8, 16

    key = jax.random.PRNGKey(0)
    keys = jax.random.split(key, 5 + 2 * N_LAYERS)

    x = jax.random.normal(keys[0], (B, C_in, L), dtype=jnp.float32)
    # std/mean arrays are (C, 1), broadcasting against (B, C, L) as in PyTorch
    mean_in = jax.random.normal(keys[1], (C_in, 1), dtype=jnp.float32)
    std_in = 0.5 + jax.random.uniform(keys[2], (C_in, 1), dtype=jnp.float32)
    mean_out = jax.random.normal(keys[3], (C_out, 1), dtype=jnp.float32)
    std_out = 0.5 + jax.random.uniform(keys[4], (C_out, 1), dtype=jnp.float32)

    chans = [C_in] + [C_out] * N_LAYERS
    weights, biases = [], []
    for i in range(N_LAYERS):
        fan_in = chans[i] * KSIZE
        wk = (jax.random.normal(keys[5 + 2 * i],
                                (chans[i + 1], chans[i], KSIZE),
                                dtype=jnp.float32) / jnp.sqrt(float(fan_in)))
        bk = 0.1 * jax.random.normal(keys[6 + 2 * i], (chans[i + 1],),
                                     dtype=jnp.float32)
        weights.append(wk)
        biases.append(bk)

    out = normalized_cnn(x, mean_in, std_in, mean_out, std_out, weights, biases)
    out = jax.block_until_ready(out)

    ref = ref_forward(x, mean_in, std_in, mean_out, std_out, weights, biases)
    assert out.shape == (B, C_out, L)
    assert jnp.allclose(out, ref, atol=1e-4, rtol=1e-4), "mismatch vs JAX reference"
    print("KERNEL_OK")
</pallas_src>

<mosaic_0001>
module attributes {stable_mosaic.version = 11 : i64} {
  func.func @normalized_cnn_kernel(%arg0: i32, %arg1: memref<8x128xf32, #tpu.memory_space<vmem>>, %arg2: memref<15x8x8xf32, #tpu.memory_space<vmem>>, %arg3: memref<5x8x1xf32, #tpu.memory_space<vmem>>, %arg4: memref<8x128xf32, #tpu.memory_space<vmem>>) attributes {dimension_semantics = [#tpu.dimension_semantics<parallel>], iteration_bounds = array<i64: 1>, scalar_prefetch = 0 : i64, scratch_operands = 0 : i64, tpu.core_type = #tpu.core_type<tc>, window_params = [{transform_indices = @transform_0, window_bounds = array<i64: 8, 128>}, {pipeline_mode = #tpu.pipeline_mode<synchronous>, transform_indices = @transform_1, window_bounds = array<i64: 15, 8, 8>}, {pipeline_mode = #tpu.pipeline_mode<synchronous>, transform_indices = @transform_2, window_bounds = array<i64: 5, 8, 1>}, {transform_indices = @transform_3, window_bounds = array<i64: 8, 128>}]} {
    %c0 = arith.constant 0 : index
    %c0_0 = arith.constant 0 : index
    %0 = vector.load %arg1[%c0, %c0_0] : memref<8x128xf32, #tpu.memory_space<vmem>>, vector<8x128xf32>
    %1 = tpu.iota {dimensions = array<i32: 1>} : vector<1x128xi32>
    %c16_i32 = arith.constant 16 : i32
    %c0_i32 = arith.constant 0 : i32
    %2 = arith.cmpi eq, %c16_i32, %c0_i32 : i32
    %c1_i32 = arith.constant 1 : i32
    %3 = arith.select %2, %c1_i32, %c16_i32 : i32
    %4 = vector.broadcast %3 : i32 to vector<1x128xi32>
    %5 = arith.remsi %1, %4 : vector<1x128xi32>
    %c0_i32_1 = arith.constant 0 : i32
    %6 = vector.broadcast %c0_i32_1 : i32 to vector<1x128xi32>
    %7 = arith.cmpi ne, %5, %6 : vector<1x128xi32>
    %c0_i32_2 = arith.constant 0 : i32
    %8 = vector.broadcast %c0_i32_2 : i32 to vector<1x128xi32>
    %9 = arith.cmpi slt, %5, %8 : vector<1x128xi32>
    %c0_i32_3 = arith.constant 0 : i32
    %10 = arith.cmpi slt, %3, %c0_i32_3 : i32
    %11 = vector.broadcast %10 : i1 to vector<1x128xi1>
    %12 = vector.broadcast %11 : vector<1x128xi1> to vector<1x128xi1>
    %13 = arith.xori %9, %12 : vector<1x128xi1>
    %14 = arith.andi %13, %7 : vector<1x128xi1>
    %15 = vector.broadcast %3 : i32 to vector<1x128xi32>
    %16 = arith.addi %5, %15 : vector<1x128xi32>
    %17 = arith.select %14, %16, %5 : vector<1x128xi1>, vector<1x128xi32>
    %c0_i32_4 = arith.constant 0 : i32
    %18 = vector.broadcast %c0_i32_4 : i32 to vector<1x128xi32>
    %19 = arith.cmpi eq, %17, %18 : vector<1x128xi32>
    %c15_i32 = arith.constant 15 : i32
    %20 = vector.broadcast %c15_i32 : i32 to vector<1x128xi32>
    %21 = arith.cmpi eq, %17, %20 : vector<1x128xi32>
    %c1_i32_5 = arith.constant 1 : i32
    %22 = tpu.dynamic_rotate %0 by %c1_i32_5 dim 1 : vector<8x128xf32>, i32 -> vector<8x128xf32>
    %c127_i32 = arith.constant 127 : i32
    %23 = tpu.dynamic_rotate %0 by %c127_i32 dim 1 : vector<8x128xf32>, i32 -> vector<8x128xf32>
    %24 = vector.shape_cast %19 : vector<1x128xi1> to vector<1x128xi1>
    %25 = vector.broadcast %24 : vector<1x128xi1> to vector<8x128xi1>
    %26 = arith.select %25, %23, %22 : vector<8x128xi1>, vector<8x128xf32>
    %27 = vector.shape_cast %21 : vector<1x128xi1> to vector<1x128xi1>
    %28 = vector.broadcast %27 : vector<1x128xi1> to vector<8x128xi1>
    %29 = arith.select %28, %22, %23 : vector<8x128xi1>, vector<8x128xf32>
    %c0_6 = arith.constant 0 : index
    %c0_7 = arith.constant 0 : index
    %c0_8 = arith.constant 0 : index
    %30 = vector.load %arg2[%c0_6, %c0_7, %c0_8] : memref<15x8x8xf32, #tpu.memory_space<vmem>>, vector<1x8x8xf32>
    %31 = vector.shape_cast %30 : vector<1x8x8xf32> to vector<8x8xf32>
    %cst = arith.constant dense<0.000000e+00> : vector<8x128xf32>
    %32 = tpu.matmul %31, %26, %cst {dimension_numbers = #tpu.dot_dimension_numbers<[1], [0], [0], [1], [0, 0, 1, 1], [], []>} : vector<8x8xf32>, vector<8x128xf32>, vector<8x128xf32> -> vector<8x128xf32>
    %c1 = arith.constant 1 : index
    %c0_9 = arith.constant 0 : index
    %c0_10 = arith.constant 0 : index
    %33 = vector.load %arg2[%c1, %c0_9, %c0_10] : memref<15x8x8xf32, #tpu.memory_space<vmem>>, vector<1x8x8xf32>
    %34 = vector.shape_cast %33 : vector<1x8x8xf32> to vector<8x8xf32>
    %cst_11 = arith.constant dense<0.000000e+00> : vector<8x128xf32>
    %35 = tpu.matmul %34, %0, %cst_11 {dimension_numbers = #tpu.dot_dimension_numbers<[1], [0], [0], [1], [0, 0, 1, 1], [], []>} : vector<8x8xf32>, vector<8x128xf32>, vector<8x128xf32> -> vector<8x128xf32>
    %36 = arith.addf %32, %35 : vector<8x128xf32>
    %c2 = arith.constant 2 : index
    %c0_12 = arith.constant 0 : index
    %c0_13 = arith.constant 0 : index
    %37 = vector.load %arg2[%c2, %c0_12, %c0_13] : memref<15x8x8xf32, #tpu.memory_space<vmem>>, vector<1x8x8xf32>
    %38 = vector.shape_cast %37 : vector<1x8x8xf32> to vector<8x8xf32>
    %cst_14 = arith.constant dense<0.000000e+00> : vector<8x128xf32>
    %39 = tpu.matmul %38, %29, %cst_14 {dimension_numbers = #tpu.dot_dimension_numbers<[1], [0], [0], [1], [0, 0, 1, 1], [], []>} : vector<8x8xf32>, vector<8x128xf32>, vector<8x128xf32> -> vector<8x128xf32>
    %40 = arith.addf %36, %39 : vector<8x128xf32>
    %c0_15 = arith.constant 0 : index
    %c0_16 = arith.constant 0 : index
    %c0_17 = arith.constant 0 : index
    %41 = vector.load %arg3[%c0_15, %c0_16, %c0_17] : memref<5x8x1xf32, #tpu.memory_space<vmem>>, vector<1x8x1xf32>
    %42 = vector.shape_cast %41 : vector<1x8x1xf32> to vector<8x1xf32>
    %43 = vector.broadcast %42 : vector<8x1xf32> to vector<8x128xf32>
    %44 = arith.addf %40, %43 : vector<8x128xf32>
    %cst_18 = arith.constant 0.000000e+00 : f32
    %45 = vector.broadcast %cst_18 : f32 to vector<8x128xf32>
    %46 = arith.cmpf ogt, %44, %45 : vector<8x128xf32>
    %47 = math.exp %44 : vector<8x128xf32>
    %cst_19 = arith.constant 1.000000e+00 : f32
    %48 = vector.broadcast %cst_19 : f32 to vector<8x128xf32>
    %49 = arith.subf %47, %48 : vector<8x128xf32>
    %50 = arith.select %46, %44, %49 : vector<8x128xi1>, vector<8x128xf32>
    %c1_i32_20 = arith.constant 1 : i32
    %51 = tpu.dynamic_rotate %50 by %c1_i32_20 dim 1 : vector<8x128xf32>, i32 -> vector<8x128xf32>
    %c127_i32_21 = arith.constant 127 : i32
    %52 = tpu.dynamic_rotate %50 by %c127_i32_21 dim 1 : vector<8x128xf32>, i32 -> vector<8x128xf32>
    %53 = vector.shape_cast %19 : vector<1x128xi1> to vector<1x128xi1>
    %54 = vector.broadcast %53 : vector<1x128xi1> to vector<8x128xi1>
    %55 = arith.select %54, %52, %51 : vector<8x128xi1>, vector<8x128xf32>
    %56 = vector.shape_cast %21 : vector<1x128xi1> to vector<1x128xi1>
    %57 = vector.broadcast %56 : vector<1x128xi1> to vector<8x128xi1>
    %58 = arith.select %57, %51, %52 : vector<8x128xi1>, vector<8x128xf32>
    %c3 = arith.constant 3 : index
    %c0_22 = arith.constant 0 : index
    %c0_23 = arith.constant 0 : index
    %59 = vector.load %arg2[%c3, %c0_22, %c0_23] : memref<15x8x8xf32, #tpu.memory_space<vmem>>, vector<1x8x8xf32>
    %60 = vector.shape_cast %59 : vector<1x8x8xf32> to vector<8x8xf32>
    %cst_24 = arith.constant dense<0.000000e+00> : vector<8x128xf32>
    %61 = tpu.matmul %60, %55, %cst_24 {dimension_numbers = #tpu.dot_dimension_numbers<[1], [0], [0], [1], [0, 0, 1, 1], [], []>} : vector<8x8xf32>, vector<8x128xf32>, vector<8x128xf32> -> vector<8x128xf32>
    %c4 = arith.constant 4 : index
    %c0_25 = arith.constant 0 : index
    %c0_26 = arith.constant 0 : index
    %62 = vector.load %arg2[%c4, %c0_25, %c0_26] : memref<15x8x8xf32, #tpu.memory_space<vmem>>, vector<1x8x8xf32>
    %63 = vector.shape_cast %62 : vector<1x8x8xf32> to vector<8x8xf32>
    %cst_27 = arith.constant dense<0.000000e+00> : vector<8x128xf32>
    %64 = tpu.matmul %63, %50, %cst_27 {dimension_numbers = #tpu.dot_dimension_numbers<[1], [0], [0], [1], [0, 0, 1, 1], [], []>} : vector<8x8xf32>, vector<8x128xf32>, vector<8x128xf32> -> vector<8x128xf32>
    %65 = arith.addf %61, %64 : vector<8x128xf32>
    %c5 = arith.constant 5 : index
    %c0_28 = arith.constant 0 : index
    %c0_29 = arith.constant 0 : index
    %66 = vector.load %arg2[%c5, %c0_28, %c0_29] : memref<15x8x8xf32, #tpu.memory_space<vmem>>, vector<1x8x8xf32>
    %67 = vector.shape_cast %66 : vector<1x8x8xf32> to vector<8x8xf32>
    %cst_30 = arith.constant dense<0.000000e+00> : vector<8x128xf32>
    %68 = tpu.matmul %67, %58, %cst_30 {dimension_numbers = #tpu.dot_dimension_numbers<[1], [0], [0], [1], [0, 0, 1, 1], [], []>} : vector<8x8xf32>, vector<8x128xf32>, vector<8x128xf32> -> vector<8x128xf32>
    %69 = arith.addf %65, %68 : vector<8x128xf32>
    %c1_31 = arith.constant 1 : index
    %c0_32 = arith.constant 0 : index
    %c0_33 = arith.constant 0 : index
    %70 = vector.load %arg3[%c1_31, %c0_32, %c0_33] : memref<5x8x1xf32, #tpu.memory_space<vmem>>, vector<1x8x1xf32>
    %71 = vector.shape_cast %70 : vector<1x8x1xf32> to vector<8x1xf32>
    %72 = vector.broadcast %71 : vector<8x1xf32> to vector<8x128xf32>
    %73 = arith.addf %69, %72 : vector<8x128xf32>
    %cst_34 = arith.constant 0.000000e+00 : f32
    %74 = vector.broadcast %cst_34 : f32 to vector<8x128xf32>
    %75 = arith.cmpf ogt, %73, %74 : vector<8x128xf32>
    %76 = math.exp %73 : vector<8x128xf32>
    %cst_35 = arith.constant 1.000000e+00 : f32
    %77 = vector.broadcast %cst_35 : f32 to vector<8x128xf32>
    %78 = arith.subf %76, %77 : vector<8x128xf32>
    %79 = arith.select %75, %73, %78 : vector<8x128xi1>, vector<8x128xf32>
    %c1_i32_36 = arith.constant 1 : i32
    %80 = tpu.dynamic_rotate %79 by %c1_i32_36 dim 1 : vector<8x128xf32>, i32 -> vector<8x128xf32>
    %c127_i32_37 = arith.constant 127 : i32
    %81 = tpu.dynamic_rotate %79 by %c127_i32_37 dim 1 : vector<8x128xf32>, i32 -> vector<8x128xf32>
    %82 = vector.shape_cast %19 : vector<1x128xi1> to vector<1x128xi1>
    %83 = vector.broadcast %82 : vector<1x128xi1> to vector<8x128xi1>
    %84 = arith.select %83, %81, %80 : vector<8x128xi1>, vector<8x128xf32>
    %85 = vector.shape_cast %21 : vector<1x128xi1> to vector<1x128xi1>
    %86 = vector.broadcast %85 : vector<1x128xi1> to vector<8x128xi1>
    %87 = arith.select %86, %80, %81 : vector<8x128xi1>, vector<8x128xf32>
    %c6 = arith.constant 6 : index
    %c0_38 = arith.constant 0 : index
    %c0_39 = arith.constant 0 : index
    %88 = vector.load %arg2[%c6, %c0_38, %c0_39] : memref<15x8x8xf32, #tpu.memory_space<vmem>>, vector<1x8x8xf32>
    %89 = vector.shape_cast %88 : vector<1x8x8xf32> to vector<8x8xf32>
    %cst_40 = arith.constant dense<0.000000e+00> : vector<8x128xf32>
    %90 = tpu.matmul %89, %84, %cst_40 {dimension_numbers = #tpu.dot_dimension_numbers<[1], [0], [0], [1], [0, 0, 1, 1], [], []>} : vector<8x8xf32>, vector<8x128xf32>, vector<8x128xf32> -> vector<8x128xf32>
    %c7 = arith.constant 7 : index
    %c0_41 = arith.constant 0 : index
    %c0_42 = arith.constant 0 : index
    %91 = vector.load %arg2[%c7, %c0_41, %c0_42] : memref<15x8x8xf32, #tpu.memory_space<vmem>>, vector<1x8x8xf32>
    %92 = vector.shape_cast %91 : vector<1x8x8xf32> to vector<8x8xf32>
    %cst_43 = arith.constant dense<0.000000e+00> : vector<8x128xf32>
    %93 = tpu.matmul %92, %79, %cst_43 {dimension_numbers = #tpu.dot_dimension_numbers<[1], [0], [0], [1], [0, 0, 1, 1], [], []>} : vector<8x8xf32>, vector<8x128xf32>, vector<8x128xf32> -> vector<8x128xf32>
    %94 = arith.addf %90, %93 : vector<8x128xf32>
    %c8 = arith.constant 8 : index
    %c0_44 = arith.constant 0 : index
    %c0_45 = arith.constant 0 : index
    %95 = vector.load %arg2[%c8, %c0_44, %c0_45] : memref<15x8x8xf32, #tpu.memory_space<vmem>>, vector<1x8x8xf32>
    %96 = vector.shape_cast %95 : vector<1x8x8xf32> to vector<8x8xf32>
    %cst_46 = arith.constant dense<0.000000e+00> : vector<8x128xf32>
    %97 = tpu.matmul %96, %87, %cst_46 {dimension_numbers = #tpu.dot_dimension_numbers<[1], [0], [0], [1], [0, 0, 1, 1], [], []>} : vector<8x8xf32>, vector<8x128xf32>, vector<8x128xf32> -> vector<8x128xf32>
    %98 = arith.addf %94, %97 : vector<8x128xf32>
    %c2_47 = arith.constant 2 : index
    %c0_48 = arith.constant 0 : index
    %c0_49 = arith.constant 0 : index
    %99 = vector.load %arg3[%c2_47, %c0_48, %c0_49] : memref<5x8x1xf32, #tpu.memory_space<vmem>>, vector<1x8x1xf32>
    %100 = vector.shape_cast %99 : vector<1x8x1xf32> to vector<8x1xf32>
    %101 = vector.broadcast %100 : vector<8x1xf32> to vector<8x128xf32>
    %102 = arith.addf %98, %101 : vector<8x128xf32>
    %cst_50 = arith.constant 0.000000e+00 : f32
    %103 = vector.broadcast %cst_50 : f32 to vector<8x128xf32>
    %104 = arith.cmpf ogt, %102, %103 : vector<8x128xf32>
    %105 = math.exp %102 : vector<8x128xf32>
    %cst_51 = arith.constant 1.000000e+00 : f32
    %106 = vector.broadcast %cst_51 : f32 to vector<8x128xf32>
    %107 = arith.subf %105, %106 : vector<8x128xf32>
    %108 = arith.select %104, %102, %107 : vector<8x128xi1>, vector<8x128xf32>
    %c1_i32_52 = arith.constant 1 : i32
    %109 = tpu.dynamic_rotate %108 by %c1_i32_52 dim 1 : vector<8x128xf32>, i32 -> vector<8x128xf32>
    %c127_i32_53 = arith.constant 127 : i32
    %110 = tpu.dynamic_rotate %108 by %c127_i32_53 dim 1 : vector<8x128xf32>, i32 -> vector<8x128xf32>
    %111 = vector.shape_cast %19 : vector<1x128xi1> to vector<1x128xi1>
    %112 = vector.broadcast %111 : vector<1x128xi1> to vector<8x128xi1>
    %113 = arith.select %112, %110, %109 : vector<8x128xi1>, vector<8x128xf32>
    %114 = vector.shape_cast %21 : vector<1x128xi1> to vector<1x128xi1>
    %115 = vector.broadcast %114 : vector<1x128xi1> to vector<8x128xi1>
    %116 = arith.select %115, %109, %110 : vector<8x128xi1>, vector<8x128xf32>
    %c9 = arith.constant 9 : index
    %c0_54 = arith.constant 0 : index
    %c0_55 = arith.constant 0 : index
    %117 = vector.load %arg2[%c9, %c0_54, %c0_55] : memref<15x8x8xf32, #tpu.memory_space<vmem>>, vector<1x8x8xf32>
    %118 = vector.shape_cast %117 : vector<1x8x8xf32> to vector<8x8xf32>
    %cst_56 = arith.constant dense<0.000000e+00> : vector<8x128xf32>
    %119 = tpu.matmul %118, %113, %cst_56 {dimension_numbers = #tpu.dot_dimension_numbers<[1], [0], [0], [1], [0, 0, 1, 1], [], []>} : vector<8x8xf32>, vector<8x128xf32>, vector<8x128xf32> -> vector<8x128xf32>
    %c10 = arith.constant 10 : index
    %c0_57 = arith.constant 0 : index
    %c0_58 = arith.constant 0 : index
    %120 = vector.load %arg2[%c10, %c0_57, %c0_58] : memref<15x8x8xf32, #tpu.memory_space<vmem>>, vector<1x8x8xf32>
    %121 = vector.shape_cast %120 : vector<1x8x8xf32> to vector<8x8xf32>
    %cst_59 = arith.constant dense<0.000000e+00> : vector<8x128xf32>
    %122 = tpu.matmul %121, %108, %cst_59 {dimension_numbers = #tpu.dot_dimension_numbers<[1], [0], [0], [1], [0, 0, 1, 1], [], []>} : vector<8x8xf32>, vector<8x128xf32>, vector<8x128xf32> -> vector<8x128xf32>
    %123 = arith.addf %119, %122 : vector<8x128xf32>
    %c11 = arith.constant 11 : index
    %c0_60 = arith.constant 0 : index
    %c0_61 = arith.constant 0 : index
    %124 = vector.load %arg2[%c11, %c0_60, %c0_61] : memref<15x8x8xf32, #tpu.memory_space<vmem>>, vector<1x8x8xf32>
    %125 = vector.shape_cast %124 : vector<1x8x8xf32> to vector<8x8xf32>
    %cst_62 = arith.constant dense<0.000000e+00> : vector<8x128xf32>
    %126 = tpu.matmul %125, %116, %cst_62 {dimension_numbers = #tpu.dot_dimension_numbers<[1], [0], [0], [1], [0, 0, 1, 1], [], []>} : vector<8x8xf32>, vector<8x128xf32>, vector<8x128xf32> -> vector<8x128xf32>
    %127 = arith.addf %123, %126 : vector<8x128xf32>
    %c3_63 = arith.constant 3 : index
    %c0_64 = arith.constant 0 : index
    %c0_65 = arith.constant 0 : index
    %128 = vector.load %arg3[%c3_63, %c0_64, %c0_65] : memref<5x8x1xf32, #tpu.memory_space<vmem>>, vector<1x8x1xf32>
    %129 = vector.shape_cast %128 : vector<1x8x1xf32> to vector<8x1xf32>
    %130 = vector.broadcast %129 : vector<8x1xf32> to vector<8x128xf32>
    %131 = arith.addf %127, %130 : vector<8x128xf32>
    %cst_66 = arith.constant 0.000000e+00 : f32
    %132 = vector.broadcast %cst_66 : f32 to vector<8x128xf32>
    %133 = arith.cmpf ogt, %131, %132 : vector<8x128xf32>
    %134 = math.exp %131 : vector<8x128xf32>
    %cst_67 = arith.constant 1.000000e+00 : f32
    %135 = vector.broadcast %cst_67 : f32 to vector<8x128xf32>
    %136 = arith.subf %134, %135 : vector<8x128xf32>
    %137 = arith.select %133, %131, %136 : vector<8x128xi1>, vector<8x128xf32>
    %c1_i32_68 = arith.constant 1 : i32
    %138 = tpu.dynamic_rotate %137 by %c1_i32_68 dim 1 : vector<8x128xf32>, i32 -> vector<8x128xf32>
    %c127_i32_69 = arith.constant 127 : i32
    %139 = tpu.dynamic_rotate %137 by %c127_i32_69 dim 1 : vector<8x128xf32>, i32 -> vector<8x128xf32>
    %140 = vector.shape_cast %19 : vector<1x128xi1> to vector<1x128xi1>
    %141 = vector.broadcast %140 : vector<1x128xi1> to vector<8x128xi1>
    %142 = arith.select %141, %139, %138 : vector<8x128xi1>, vector<8x128xf32>
    %143 = vector.shape_cast %21 : vector<1x128xi1> to vector<1x128xi1>
    %144 = vector.broadcast %143 : vector<1x128xi1> to vector<8x128xi1>
    %145 = arith.select %144, %138, %139 : vector<8x128xi1>, vector<8x128xf32>
    %c12 = arith.constant 12 : index
    %c0_70 = arith.constant 0 : index
    %c0_71 = arith.constant 0 : index
    %146 = vector.load %arg2[%c12, %c0_70, %c0_71] : memref<15x8x8xf32, #tpu.memory_space<vmem>>, vector<1x8x8xf32>
    %147 = vector.shape_cast %146 : vector<1x8x8xf32> to vector<8x8xf32>
    %cst_72 = arith.constant dense<0.000000e+00> : vector<8x128xf32>
    %148 = tpu.matmul %147, %142, %cst_72 {dimension_numbers = #tpu.dot_dimension_numbers<[1], [0], [0], [1], [0, 0, 1, 1], [], []>} : vector<8x8xf32>, vector<8x128xf32>, vector<8x128xf32> -> vector<8x128xf32>
    %c13 = arith.constant 13 : index
    %c0_73 = arith.constant 0 : index
    %c0_74 = arith.constant 0 : index
    %149 = vector.load %arg2[%c13, %c0_73, %c0_74] : memref<15x8x8xf32, #tpu.memory_space<vmem>>, vector<1x8x8xf32>
    %150 = vector.shape_cast %149 : vector<1x8x8xf32> to vector<8x8xf32>
    %cst_75 = arith.constant dense<0.000000e+00> : vector<8x128xf32>
    %151 = tpu.matmul %150, %137, %cst_75 {dimension_numbers = #tpu.dot_dimension_numbers<[1], [0], [0], [1], [0, 0, 1, 1], [], []>} : vector<8x8xf32>, vector<8x128xf32>, vector<8x128xf32> -> vector<8x128xf32>
    %152 = arith.addf %148, %151 : vector<8x128xf32>
    %c14 = arith.constant 14 : index
    %c0_76 = arith.constant 0 : index
    %c0_77 = arith.constant 0 : index
    %153 = vector.load %arg2[%c14, %c0_76, %c0_77] : memref<15x8x8xf32, #tpu.memory_space<vmem>>, vector<1x8x8xf32>
    %154 = vector.shape_cast %153 : vector<1x8x8xf32> to vector<8x8xf32>
    %cst_78 = arith.constant dense<0.000000e+00> : vector<8x128xf32>
    %155 = tpu.matmul %154, %145, %cst_78 {dimension_numbers = #tpu.dot_dimension_numbers<[1], [0], [0], [1], [0, 0, 1, 1], [], []>} : vector<8x8xf32>, vector<8x128xf32>, vector<8x128xf32> -> vector<8x128xf32>
    %156 = arith.addf %152, %155 : vector<8x128xf32>
    %c4_79 = arith.constant 4 : index
    %c0_80 = arith.constant 0 : index
    %c0_81 = arith.constant 0 : index
    %157 = vector.load %arg3[%c4_79, %c0_80, %c0_81] : memref<5x8x1xf32, #tpu.memory_space<vmem>>, vector<1x8x1xf32>
    %158 = vector.shape_cast %157 : vector<1x8x1xf32> to vector<8x1xf32>
    %159 = vector.broadcast %158 : vector<8x1xf32> to vector<8x128xf32>
    %160 = arith.addf %156, %159 : vector<8x128xf32>
    %c0_82 = arith.constant 0 : index
    %c0_83 = arith.constant 0 : index
    %161 = vector.load %arg4[%c0_82, %c0_83] : memref<8x128xf32, #tpu.memory_space<vmem>>, vector<8x128xf32>
    tpu.vector_store %arg4[%c0_82, %c0_83], %160 {strides = array<i32>} : memref<8x128xf32, #tpu.memory_space<vmem>>, vector<8x128xf32>,
    return
  }
  func.func @transform_0(%arg0: i32) -> (i32, i32) {
    %c0_i32 = arith.constant 0 : i32
    %c0_i32_0 = arith.constant 0 : i32
    return %c0_i32, %arg0 : i32, i32
  }
  func.func @transform_1(%arg0: i32) -> (i32, i32, i32) {
    %c0_i32 = arith.constant 0 : i32
    %c0_i32_0 = arith.constant 0 : i32
    %c0_i32_1 = arith.constant 0 : i32
    %c0_i32_2 = arith.constant 0 : i32
    return %c0_i32, %c0_i32_0, %c0_i32_1 : i32, i32, i32
  }
  func.func @transform_2(%arg0: i32) -> (i32, i32, i32) {
    %c0_i32 = arith.constant 0 : i32
    %c0_i32_0 = arith.constant 0 : i32
    %c0_i32_1 = arith.constant 0 : i32
    %c0_i32_2 = arith.constant 0 : i32
    return %c0_i32, %c0_i32_0, %c0_i32_1 : i32, i32, i32
  }
  func.func @transform_3(%arg0: i32) -> (i32, i32) {
    %c0_i32 = arith.constant 0 : i32
    %c0_i32_0 = arith.constant 0 : i32
    return %c0_i32, %arg0 : i32, i32
  }
}

</mosaic_0001>

<bundles_post_ra>
// kernel: tpu_custom_call.1
= control target key start
LH: loop header
LB: loop body
LE: loop exit
PB: predicated region body
PF: predicated region fallthrough
CT: control target
= control target key end

     0   :  { %s1452_s16 = smov 1   ;;  %v1453_v2 = vmov 0.0   ;;  %vm45_vm0 = vcmask 64512   ;;  %vm1454_vm1 = vmmov 0   ;;  %s1651_s0 = inlined_call_operand.vmem [shape: f32[8,128], index: 0, kind: input, shape index: {}]   ;;  %s1652_s1 = inlined_call_operand.vmem [shape: f32[15,8,8], index: 1, kind: input, shape index: {}]   ;;  %s1653_s2 = inlined_call_operand.vmem [shape: f32[5,8,1], index: 2, kind: input, shape index: {}]   ;;  %s1654_s3 = inlined_call_operand.hbm [shape: f32[8,128], index: 3, kind: output, shape index: {}]  }
   0x1   :  { %v15_v0 = vld [vmem:[%s1651_s0] sm:$0xff]  ;;  %v1270_v1 = vld [vmem:[%s1652_s1 + $0x8] sm:$0xff]  ;;  %1337 = vmatprep.subr.mxu0 %v1453_v2  ;;  %1339 = vmatprep.mubr.msk.f32.mxu0 %vm1454_vm1, %v1453_v2 }
   0x2   :  { %32 = vrot.lane.b32.xlu0 %v15_v0, %s1452_s16  ;;  %1338 = vmatpush3.msra.mxu0 %v15_v0 }
   0x3   :  { %8 = vsyncpa [#allocation3], 0  ;;  %1340 = vmatmul.mubr.msk.f32.vlgmr.msra.gmra.mrb[0].mxu0 %vm45_vm0, %v1270_v1  ;;  %1342 = vmatprep.subr.mxu1 %v1453_v2  ;;  %v268_v3 = vld [vmem:[%s1653_s2] sm:$0xff]  ;;  %s1455_s18 = smov 127   ;;  %v1456_v4 = vmov 0   ;;  %v16_v5 = vlaneseq  ;;  %v1273_v13 = vld [vmem:[%s1652_s1 + $0x10] sm:$0xff] }
   0x4   :  { %1347 = vmatprep.subr.mxu0 %v1453_v2  ;;  %1344 = vmatprep.mubr.msk.f32.mxu1 %vm1454_vm1, %v1453_v2  ;;  %v42_v12 = vld [vmem:[%s1652_s1] sm:$0xff]  ;;  %v1282_v31 = vld [vmem:[%s1653_s2 + $0x8] sm:$0xff]  ;;  %v1276_v34 = vld [vmem:[%s1652_s1 + $0x18] sm:$0xff] }
   0x5   :  { %1349 = vmatprep.mubr.msk.f32.mxu0 %vm1454_vm1, %v1453_v2  ;;  %1418 = vset.pattern.permute.xlu1 %v1456_v4  ;;  %v17_v6 = vand.u32 127, %v16_v5  ;;  %v1277_v30 = vld [vmem:[%s1652_s1 + $0x20] sm:$0xff]  ;;  %v1280_v35 = vld [vmem:[%s1652_s1 + $0x28] sm:$0xff]  ;;  %v1285_v52 = vld [vmem:[%s1652_s1 + $0x38] sm:$0xff] }
   0x6   :  { %34 = vrot.lane.b32.xlu0 %v15_v0, %s1455_s18  ;;  %271 = vperm.xlu1 %1418, %v268_v3   ;;  %v1290_v53 = vld [vmem:[%s1653_s2 + $0x10] sm:$0xff]  ;;  %v1298_v54 = vld [vmem:[%s1653_s2 + $0x18] sm:$0xff]  ;;  %v1288_v58 = vld [vmem:[%s1652_s1 + $0x40] sm:$0xff] }
   0x7   :  { %1419 = vset.pattern.permute.xlu0 %v1456_v4  ;;  %v22_v7 = vand.u32 15, %v17_v6  ;;  %v1284_v57 = vld [vmem:[%s1652_s1 + $0x30] sm:$0xff] }
   0x9   :  { %vm1499_vm2 = vcmp.eq.s32.totalorder %v22_v7, 15  ;;  %vm1503_vm3 = vcmp.eq.s32.totalorder %v22_v7, 0 }
  0x74   :  { %v33_v8 = vpop.permute.xlu0 %32 }
  0x78   :  { %v35_v11 = vpop.permute.xlu0 %34 }
  0x79   :  { %v41_v14 = vsel %vm1499_vm2, %v33_v8, %v35_v11  ;;  %v38_v15 = vsel %vm1503_vm3, %v35_v11, %v33_v8 }
  0x7a   :  { %1343 = vmatpush3.msra.mxu1 %v38_v15  ;;  %1348 = vmatpush3.msra.mxu0 %v41_v14 }
  0x7b   :  { %1345 = vmatmul.mubr.msk.f32.vlgmr.msra.gmra.mrb[0].mxu1 %vm45_vm0, %v42_v12  ;;  %1350 = vmatmul.mubr.msk.f32.vlgmr.msra.gmra.mrb[2].mxu0 %vm45_vm0, %v1273_v13  ;;  %v1293_v13 = vld [vmem:[%s1652_s1 + $0x50] sm:$0xff] }
  0x7c   :  { %1352 = vmatprep.subr.mxu1 %v1453_v2  ;;  %1354 = vmatprep.mubr.msk.f32.mxu1 %vm1454_vm1, %v1453_v2 }
  0x7d   :  { %1357 = vmatprep.subr.mxu0 %v1453_v2  ;;  %1359 = vmatprep.mubr.msk.f32.mxu0 %vm1454_vm1, %v1453_v2 }
  0x85   :  { %v272_v23 = vpop.permute.xlu1 %271 }
  0xd6   :  { %v115_v16 = vpop.f32.mrb[0].mxu0 }
  0xd7   :  { %v1341_v17 = vpop.f32.mrb[1].mxu0 }
  0xd8   :  { %v1292_v17 = vld [vmem:[%s1652_s1 + $0x48] sm:$0xff] }
 0x14e   :  { %v188_v18 = vpop.f32.mrb[0].mxu1  ;;  %v263_v19 = vpop.f32.mrb[2].mxu0 }
 0x14f   :  { %v189_v20 = vadd.f32 %v188_v18, %v115_v16  ;;  %v1346_v21 = vpop.f32.mrb[1].mxu1  ;;  %v1351_v22 = vpop.f32.mrb[3].mxu0  ;;  %v1296_v18 = vld [vmem:[%s1652_s1 + $0x58] sm:$0xff] }
 0x151   :  { %v267_v24 = vadd.f32 %v263_v19, %v189_v20 }
 0x153   :  { %v274_v25 = vadd.f32 %v272_v23, %v267_v24 }
 0x155   :  { %v276_v26 = vmul.f32 1.442695, %v274_v25  ;;  %vm275_vm4 = vcmp.gt.f32.partialorder %v274_v25, 0.0 }
 0x157   :  { %1420 = vpow2.f32 %v276_v26 }
 0x161   :  { %v1421_v27 = vpop.eup %1420 }
 0x162   :  { %v1275_v28 = vadd.f32 -1.0, %v1421_v27 }
 0x164   :  { %v279_v29 = vsel %vm275_vm4, %v274_v25, %v1275_v28 }
 0x165   :  { %282 = vrot.lane.b32.xlu0 %v279_v29, %s1455_s18  ;;  %280 = vrot.lane.b32.xlu1 %v279_v29, %s1452_s16 }
 0x166   :  { %1353 = vmatpush3.msra.mxu1 %v279_v29 }
 0x167   :  { %1355 = vmatmul.mubr.msk.f32.vlgmr.msra.gmra.mrb[2].mxu1 %vm45_vm0, %v1277_v30  ;;  %1362 = vmatprep.subr.mxu1 %v1453_v2 }
 0x168   :  { %1364 = vmatprep.mubr.msk.f32.mxu1 %vm1454_vm1, %v1453_v2 }
 0x169   :  { %516 = vperm.xlu1 %1418, %v1282_v31  }
 0x1d7   :  { %v283_v32 = vpop.permute.xlu0 %282  ;;  %v281_v33 = vpop.permute.xlu1 %280 }
 0x1d8   :  { %v284_v36 = vsel %vm1503_vm3, %v283_v32, %v281_v33  ;;  %v285_v37 = vsel %vm1499_vm2, %v281_v33, %v283_v32 }
 0x1d9   :  { %1358 = vmatpush3.msra.mxu0 %v284_v36  ;;  %1363 = vmatpush3.msra.mxu1 %v285_v37  ;;  %v1306_v36 = vld [vmem:[%s1653_s2 + $0x20] sm:$0xff] }
 0x1da   :  { %1360 = vmatmul.mubr.msk.f32.vlgmr.msra.gmra.mrb[4].mxu0 %vm45_vm0, %v1276_v34  ;;  %1365 = vmatmul.mubr.msk.f32.vlgmr.msra.gmra.mrb[4].mxu1 %vm45_vm0, %v1280_v35  ;;  %v1301_v35 = vld [vmem:[%s1652_s1 + $0x68] sm:$0xff] }
 0x1db   :  { %1367 = vmatprep.subr.mxu0 %v1453_v2  ;;  %1369 = vmatprep.mubr.msk.f32.mxu0 %vm1454_vm1, %v1453_v2 }
 0x1dc   :  { %1372 = vmatprep.subr.mxu1 %v1453_v2  ;;  %1374 = vmatprep.mubr.msk.f32.mxu1 %vm1454_vm1, %v1453_v2 }
 0x1e8   :  { %v517_v46 = vpop.permute.xlu1 %516 }
 0x23a   :  { %v359_v38 = vpop.f32.mrb[2].mxu1 }
 0x23b   :  { %v1356_v39 = vpop.f32.mrb[3].mxu1 }
 0x23c   :  { %v1300_v39 = vld [vmem:[%s1652_s1 + $0x60] sm:$0xff] }
 0x2ad   :  { %v432_v40 = vpop.f32.mrb[4].mxu0  ;;  %v507_v41 = vpop.f32.mrb[4].mxu1 }
 0x2ae   :  { %v433_v42 = vadd.f32 %v432_v40, %v359_v38  ;;  %v1361_v43 = vpop.f32.mrb[5].mxu0  ;;  %v1366_v44 = vpop.f32.mrb[5].mxu1  ;;  %v1304_v40 = vld [vmem:[%s1652_s1 + $0x70] sm:$0xff]  ;;  %s1457_s1 = smov [#allocation2]  }
 0x2af   :  { %s1262_s2 = sshll.u32 %s1457_s1, 4  ;;  %s1263_s2 = int_to_ptr.vmem [resolvable:$true] %s1262_s2 }
 0x2b0   :  { %v511_v45 = vadd.f32 %v507_v41, %v433_v42  ;;  %s1428_s27 = scalar_lea.vmem %s1263_s2, 128  ;;  %p1433_p1 = scmp.lt.s32.totalorder %s1263_s2, %s1263_s2 }
 0x2b1   :  { %p1429_p0 = scmp.ne.s32.totalorder %s1263_s2, %s1428_s27  ;;  %p1434_p2 = scmp.lt.s32.totalorder %s1428_s27, %s1428_s27 }
 0x2b2   :  { %v519_v47 = vadd.f32 %v517_v46, %v511_v45 }
 0x2b3   :  { %p1435_p3 = por %p1434_p2, %p1433_p1 }
 0x2b4   :  { %v521_v48 = vmul.f32 1.442695, %v519_v47  ;;  %vm520_vm5 = vcmp.gt.f32.partialorder %v519_v47, 0.0 }
 0x2b5   :  { %p1436_p4 = pnand %p1435_p3, %p1429_p0 }
 0x2b6   :  { %1422 = vpow2.f32 %v521_v48 }
 0x2c0   :  { %v1423_v49 = vpop.eup %1422 }
 0x2c1   :  { %v1283_v50 = vadd.f32 -1.0, %v1423_v49 }
 0x2c3   :  { %v524_v51 = vsel %vm520_vm5, %v519_v47, %v1283_v50 }
 0x2c4   :  { %527 = vrot.lane.b32.xlu1 %v524_v51, %s1455_s18  ;;  %525 = vrot.lane.b32.xlu0 %v524_v51, %s1452_s16 }
 0x2c5   :  { %1368 = vmatpush3.msra.mxu0 %v524_v51 }
 0x2c6   :  { %1370 = vmatmul.mubr.msk.f32.vlgmr.msra.gmra.mrb[6].mxu0 %vm45_vm0, %v1285_v52  ;;  %1377 = vmatprep.subr.mxu0 %v1453_v2 }
 0x2c7   :  { %1379 = vmatprep.mubr.msk.f32.mxu0 %vm1454_vm1, %v1453_v2 }
 0x2c8   :  { %761 = vperm.xlu0 %1419, %v1290_v53  }
 0x2cc   :  { %1006 = vperm.xlu0 %1419, %v1298_v54  }
 0x336   :  { %v528_v55 = vpop.permute.xlu1 %527  ;;  %v526_v56 = vpop.permute.xlu0 %525 }
 0x337   :  { %v529_v59 = vsel %vm1503_vm3, %v528_v55, %v526_v56  ;;  %v530_v60 = vsel %vm1499_vm2, %v526_v56, %v528_v55 }
 0x338   :  { %1373 = vmatpush3.msra.mxu1 %v529_v59  ;;  %1378 = vmatpush3.msra.mxu0 %v530_v60 }
 0x339   :  { %1375 = vmatmul.mubr.msk.f32.vlgmr.msra.gmra.mrb[6].mxu1 %vm45_vm0, %v1284_v57  ;;  %1380 = vmatmul.mubr.msk.f32.vlgmr.msra.gmra.mrb[8].mxu0 %vm45_vm0, %v1288_v58 }
 0x33a   :  { %1382 = vmatprep.subr.mxu1 %v1453_v2  ;;  %1384 = vmatprep.mubr.msk.f32.mxu1 %vm1454_vm1, %v1453_v2 }
 0x33b   :  { %1387 = vmatprep.subr.mxu0 %v1453_v2  ;;  %1389 = vmatprep.mubr.msk.f32.mxu0 %vm1454_vm1, %v1453_v2 }
 0x347   :  { %v762_v6 = vpop.permute.xlu0 %761 }
 0x34b   :  { %v1007_v29 = vpop.permute.xlu0 %1006 }
 0x399   :  { %v604_v61 = vpop.f32.mrb[6].mxu0 }
 0x39a   :  { %v1371_v62 = vpop.f32.mrb[7].mxu0 }
 0x40c   :  { %v677_v63 = vpop.f32.mrb[6].mxu1  ;;  %v752_v0 = vpop.f32.mrb[8].mxu0 }
 0x40d   :  { %v678_v1 = vadd.f32 %v677_v63, %v604_v61  ;;  %v1376_v3 = vpop.f32.mrb[7].mxu1  ;;  %v1381_v4 = vpop.f32.mrb[9].mxu0 }
 0x40f   :  { %v756_v5 = vadd.f32 %v752_v0, %v678_v1 }
 0x411   :  { %v764_v7 = vadd.f32 %v762_v6, %v756_v5 }
 0x413   :  { %v766_v8 = vmul.f32 1.442695, %v764_v7  ;;  %vm765_vm6 = vcmp.gt.f32.partialorder %v764_v7, 0.0 }
 0x415   :  { %1424 = vpow2.f32 %v766_v8 }
 0x41f   :  { %v1425_v11 = vpop.eup %1424 }
 0x420   :  { %v1291_v12 = vadd.f32 -1.0, %v1425_v11 }
 0x422   :  { %v769_v14 = vsel %vm765_vm6, %v764_v7, %v1291_v12 }
 0x423   :  { %770 = vrot.lane.b32.xlu1 %v769_v14, %s1452_s16  ;;  %1383 = vmatpush3.msra.mxu1 %v769_v14 }
 0x424   :  { %1385 = vmatmul.mubr.msk.f32.vlgmr.msra.gmra.mrb[8].mxu1 %vm45_vm0, %v1293_v13  ;;  %1392 = vmatprep.subr.mxu1 %v1453_v2 }
 0x425   :  { %1394 = vmatprep.mubr.msk.f32.mxu1 %vm1454_vm1, %v1453_v2 }
 0x427   :  { %772 = vrot.lane.b32.xlu1 %v769_v14, %s1455_s18 }
 0x495   :  { %v771_v15 = vpop.permute.xlu1 %770 }
 0x499   :  { %v773_v16 = vpop.permute.xlu1 %772 }
 0x49a   :  { %v774_v19 = vsel %vm1503_vm3, %v773_v16, %v771_v15  ;;  %v775_v20 = vsel %vm1499_vm2, %v771_v15, %v773_v16 }
 0x49b   :  { %1388 = vmatpush3.msra.mxu0 %v774_v19  ;;  %1393 = vmatpush3.msra.mxu1 %v775_v20 }
 0x49c   :  { %1390 = vmatmul.mubr.msk.f32.vlgmr.msra.gmra.mrb[10].mxu0 %vm45_vm0, %v1292_v17  ;;  %1395 = vmatmul.mubr.msk.f32.vlgmr.msra.gmra.mrb[10].mxu1 %vm45_vm0, %v1296_v18 }
 0x49d   :  { %1397 = vmatprep.subr.mxu0 %v1453_v2  ;;  %1399 = vmatprep.mubr.msk.f32.mxu0 %vm1454_vm1, %v1453_v2 }
 0x49e   :  { %1402 = vmatprep.subr.mxu1 %v1453_v2  ;;  %1404 = vmatprep.mubr.msk.f32.mxu1 %vm1454_vm1, %v1453_v2 }
 0x4f7   :  { %v849_v21 = vpop.f32.mrb[8].mxu1 }
 0x4f8   :  { %v1386_v22 = vpop.f32.mrb[9].mxu1 }
 0x56f   :  { %v922_v23 = vpop.f32.mrb[10].mxu0  ;;  %v997_v24 = vpop.f32.mrb[10].mxu1 }
 0x570   :  { %v923_v25 = vadd.f32 %v922_v23, %v849_v21  ;;  %v1391_v26 = vpop.f32.mrb[11].mxu0  ;;  %v1396_v27 = vpop.f32.mrb[11].mxu1 }
 0x572   :  { %v1001_v28 = vadd.f32 %v997_v24, %v923_v25 }
 0x574   :  { %v1009_v30 = vadd.f32 %v1007_v29, %v1001_v28 }
 0x576   :  { %v1011_v31 = vmul.f32 1.442695, %v1009_v30  ;;  %vm1010_vm7 = vcmp.gt.f32.partialorder %v1009_v30, 0.0 }
 0x578   :  { %1426 = vpow2.f32 %v1011_v31 }
 0x582   :  { %v1427_v32 = vpop.eup %1426 }
 0x583   :  { %v1299_v33 = vadd.f32 -1.0, %v1427_v32 }
 0x585   :  { %v1014_v34 = vsel %vm1010_vm7, %v1009_v30, %v1299_v33 }
 0x586   :  { %1017 = vrot.lane.b32.xlu0 %v1014_v34, %s1455_s18  ;;  %1015 = vrot.lane.b32.xlu1 %v1014_v34, %s1452_s16 }
 0x587   :  { %1398 = vmatpush3.msra.mxu0 %v1014_v34 }
 0x588   :  { %1400 = vmatmul.mubr.msk.f32.vlgmr.msra.gmra.mrb[12].mxu0 %vm45_vm0, %v1301_v35  ;;  %1407 = vmatprep.subr.mxu0 %v1453_v2 }
 0x589   :  { %1409 = vmatprep.mubr.msk.f32.mxu0 %vm1454_vm1, %v1453_v2 }
 0x58a   :  { %1251 = vperm.xlu1 %1418, %v1306_v36  }
 0x5f8   :  { %v1018_v37 = vpop.permute.xlu0 %1017  ;;  %v1016_v38 = vpop.permute.xlu1 %1015 }
 0x5f9   :  { %v1019_v41 = vsel %vm1503_vm3, %v1018_v37, %v1016_v38  ;;  %v1020_v42 = vsel %vm1499_vm2, %v1016_v38, %v1018_v37 }
 0x5fa   :  { %1403 = vmatpush3.msra.mxu1 %v1019_v41  ;;  %1408 = vmatpush3.msra.mxu0 %v1020_v42 }
 0x5fb   :  { %1405 = vmatmul.mubr.msk.f32.vlgmr.msra.gmra.mrb[12].mxu1 %vm45_vm0, %v1300_v39  ;;  %1410 = vmatmul.mubr.msk.f32.vlgmr.msra.gmra.mrb[14].mxu0 %vm45_vm0, %v1304_v40 }
 0x609   :  { %v1252_v49 = vpop.permute.xlu1 %1251 }
 0x65b   :  { %v1094_v2 = vpop.f32.mrb[12].mxu0 }
 0x65c   :  { %v1401_v43 = vpop.f32.mrb[13].mxu0 }
 0x6ce   :  { %v1167_v44 = vpop.f32.mrb[12].mxu1  ;;  %v1242_v45 = vpop.f32.mrb[14].mxu0 }
 0x6cf   :  { %v1168_v46 = vadd.f32 %v1167_v44, %v1094_v2  ;;  %v1406_v47 = vpop.f32.mrb[13].mxu1  ;;  %v1411_v48 = vpop.f32.mrb[15].mxu0 }
 0x6d1   :  { %v1246_v10 = vadd.f32 %v1242_v45, %v1168_v46 }
 0x6d3   :  { %v1254_v50 = vadd.f32 %v1252_v49, %v1246_v10 }
 0x6d5   :  { %1255 = vst [vmem:[#allocation2] sm:$0xff] %v1254_v50 }
 0x6d6   :  { %1439 = shalt.err (!%p1436_p4)
}
 0x6d7   :  { %s1440_s30 = scalar_lea.hbm %s1654_s3, 128 }
 0x6d8   :  { %p1441_p5 = scmp.ne.s32.totalorder %s1654_s3, %s1440_s30  ;;  %p1444_p6 = scmp.lt.u32.totalorder %s1440_s30, %s1654_s3 }
 0x6da   :  { %p1446_p7 = pnand %p1444_p6, %p1441_p5 }
 0x6dc   :  { %1449 = shalt.err (!%p1446_p7)
}
 0x6dd   :  { %1265 = dma.vmem_to_hbm [thread:$0]  %s1263_s2, 128, %s1654_s3, [#allocation3]  }
 0x6de   :  { %1450 = dma.done.wait [#allocation3], 128  }
 0x6df   :  { %1451 = vsyncadd [#allocation3], 4294967168 }
 0x6e0   :  { %1269 = vsyncpa [#allocation3], 1 }

</bundles_post_ra>
